<compile_context>
chip_gen: v7x
topology: tpu7x:2x2x1
jax: 0.10.0
libtpu: 0.0.40
codegen_flags: <defaults>
</compile_context>

<pallas_src>
import functools

import jax
import jax.numpy as jnp
from jax.experimental import pallas as pl
from jax.experimental.pallas import tpu as pltpu


# Activation map matching balm.activation.GLU_variants
_ACTIVATIONS = {
    "glu": jax.nn.sigmoid,
    "swiglu": jax.nn.silu,
    "geglu": functools.partial(jax.nn.gelu, approximate=False),  # F.gelu default = exact
    "reglu": jax.nn.relu,
}


def _round_up(x, m):
    return ((x + m - 1) // m) * m


def _glu_kernel(x_ref, wv_ref, wg_ref, bv_ref, bg_ref, o_ref,
                acc_v_ref, acc_g_ref, *, act_fn):
    """One (tm, tn) output tile; K-reduction accumulated in f32 scratch."""
    k_idx = pl.program_id(2)

    @pl.when(k_idx == 0)
    def _():
        acc_v_ref[...] = jnp.zeros_like(acc_v_ref)
        acc_g_ref[...] = jnp.zeros_like(acc_g_ref)

    x = x_ref[...]  # shared load for both matmuls
    acc_v_ref[...] += jnp.dot(x, wv_ref[...], preferred_element_type=jnp.float32)
    acc_g_ref[...] += jnp.dot(x, wg_ref[...], preferred_element_type=jnp.float32)

    @pl.when(k_idx == pl.num_programs(2) - 1)
    def _():
        value = acc_v_ref[...] + bv_ref[...].astype(jnp.float32)
        gate = acc_g_ref[...] + bg_ref[...].astype(jnp.float32)
        o_ref[...] = (value * act_fn(gate)).astype(o_ref.dtype)


def glu_forward(x, w_value, b_value, w_gate, b_gate, activation="swiglu", *,
                tm=256, tn=256, tk=512, compute_dtype=None):
    """GLU variant forward pass.

    x        : (batch, seq, in_dim)
    w_value  : (in_dim, out_dim)
    b_value  : (out_dim,)   (pass zeros when bias=False)
    w_gate   : (in_dim, out_dim)
    b_gate   : (out_dim,)
    compute_dtype : optional dtype (e.g. jnp.bfloat16) for matmul operands;
                    accumulation stays f32, output keeps x.dtype.
    """
    act_fn = _ACTIVATIONS[activation]
    batch, seq, in_dim = x.shape
    out_dim = w_value.shape[1]
    out_dtype = x.dtype

    m = batch * seq
    k = in_dim
    n = out_dim

    # Clamp tiles for small problems, keep TPU layout constraints:
    #   sublane (second-last) dims multiples of 8, lane (last) dims multiples of 128.
    tm_eff = min(tm, _round_up(m, 8))
    tn_eff = min(tn, _round_up(n, 128))
    tk_eff = min(tk, _round_up(k, 128))

    m_pad = _round_up(m, tm_eff)
    n_pad = _round_up(n, tn_eff)
    k_pad = _round_up(k, tk_eff)

    x2d = x.reshape(m, k)
    if compute_dtype is not None:
        x2d = x2d.astype(compute_dtype)
        w_value = w_value.astype(compute_dtype)
        w_gate = w_gate.astype(compute_dtype)

    # Zero-pad (zeros along K contribute nothing to the dot products).
    x2d = jnp.pad(x2d, ((0, m_pad - m), (0, k_pad - k)))
    wv = jnp.pad(w_value, ((0, k_pad - k), (0, n_pad - n)))
    wg = jnp.pad(w_gate, ((0, k_pad - k), (0, n_pad - n)))
    bv2d = jnp.pad(b_value.reshape(1, n).astype(jnp.float32), ((0, 0), (0, n_pad - n)))
    bg2d = jnp.pad(b_gate.reshape(1, n).astype(jnp.float32), ((0, 0), (0, n_pad - n)))

    grid = (m_pad // tm_eff, n_pad // tn_eff, k_pad // tk_eff)

    out2d = pl.pallas_call(
        functools.partial(_glu_kernel, act_fn=act_fn),
        out_shape=jax.ShapeDtypeStruct((m_pad, n_pad), out_dtype),
        grid_spec=pltpu.PrefetchScalarGridSpec(
            num_scalar_prefetch=0,
            grid=grid,
            in_specs=[
                pl.BlockSpec((tm_eff, tk_eff), lambda i, j, kk: (i, kk)),   # x rows
                pl.BlockSpec((tk_eff, tn_eff), lambda i, j, kk: (kk, j)),   # W_value tile
                pl.BlockSpec((tk_eff, tn_eff), lambda i, j, kk: (kk, j)),   # W_gate tile
                pl.BlockSpec((1, tn_eff), lambda i, j, kk: (0, j)),         # b_value tile
                pl.BlockSpec((1, tn_eff), lambda i, j, kk: (0, j)),         # b_gate tile
            ],
            out_specs=pl.BlockSpec((tm_eff, tn_eff), lambda i, j, kk: (i, j)),
            scratch_shapes=[
                pltpu.VMEM((tm_eff, tn_eff), jnp.float32),  # value accumulator
                pltpu.VMEM((tm_eff, tn_eff), jnp.float32),  # gate accumulator
            ],
        ),
        compiler_params=pltpu.CompilerParams(
            dimension_semantics=("parallel", "parallel", "arbitrary"),
        ),
    )(x2d, wv, wg, bv2d, bg2d)

    return out2d[:m, :n].reshape(batch, seq, out_dim)


def init_glu_params(key, in_dim, out_dim, bias=True, dtype=jnp.float32):
    """Deterministic init mirroring nn.Linear: U(-1/sqrt(in_dim), 1/sqrt(in_dim))."""
    kv_w, kv_b, kg_w, kg_b = jax.random.split(key, 4)
    bound = 1.0 / (in_dim ** 0.5)
    w_value = jax.random.uniform(kv_w, (in_dim, out_dim), dtype, -bound, bound)
    w_gate = jax.random.uniform(kg_w, (in_dim, out_dim), dtype, -bound, bound)
    if bias:
        b_value = jax.random.uniform(kv_b, (out_dim,), dtype, -bound, bound)
        b_gate = jax.random.uniform(kg_b, (out_dim,), dtype, -bound, bound)
    else:
        b_value = jnp.zeros((out_dim,), dtype)
        b_gate = jnp.zeros((out_dim,), dtype)
    return w_value, b_value, w_gate, b_gate


def _reference(x, w_value, b_value, w_gate, b_gate, activation):
    act_fn = _ACTIVATIONS[activation]
    value = x @ w_value + b_value
    gate = x @ w_gate + b_gate
    return value * act_fn(gate)


if __name__ == "__main__":
    key = jax.random.PRNGKey(0)
    k_x, k_p = jax.random.split(key)

    batch, seq, in_dim, out_dim = 2, 8, 32, 32
    activation = "swiglu"
    bias = True

    x = jax.random.normal(k_x, (batch, seq, in_dim), jnp.float32)
    w_value, b_value, w_gate, b_gate = init_glu_params(k_p, in_dim, out_dim, bias=bias)

    out = glu_forward(x, w_value, b_value, w_gate, b_gate, activation=activation)
    out = jax.block_until_ready(out)

    ref = _reference(x, w_value, b_value, w_gate, b_gate, activation)
    assert out.shape == (batch, seq, out_dim)
    assert jnp.allclose(out, ref, atol=1e-5, rtol=1e-5), "mismatch vs reference"

    print("KERNEL_OK")
</pallas_src>

<mosaic_0001>
module attributes {stable_mosaic.version = 11 : i64} {
  func.func @_glu_kernel(%arg0: i32, %arg1: i32, %arg2: i32, %arg3: memref<16x128xf32, #tpu.memory_space<vmem>>, %arg4: memref<128x128xf32, #tpu.memory_space<vmem>>, %arg5: memref<128x128xf32, #tpu.memory_space<vmem>>, %arg6: memref<1x128xf32, #tpu.memory_space<vmem>>, %arg7: memref<1x128xf32, #tpu.memory_space<vmem>>, %arg8: memref<16x128xf32, #tpu.memory_space<vmem>>, %arg9: memref<16x128xf32, #tpu.memory_space<vmem>>, %arg10: memref<16x128xf32, #tpu.memory_space<vmem>>) attributes {dimension_semantics = [#tpu.dimension_semantics<parallel>, #tpu.dimension_semantics<parallel>, #tpu.dimension_semantics<arbitrary>], iteration_bounds = array<i64: 1, 1, 1>, scalar_prefetch = 0 : i64, scratch_operands = 2 : i64, tpu.core_type = #tpu.core_type<tc>, window_params = [{transform_indices = @transform_0, window_bounds = array<i64: 16, 128>}, {transform_indices = @transform_1, window_bounds = array<i64: 128, 128>}, {transform_indices = @transform_2, window_bounds = array<i64: 128, 128>}, {transform_indices = @transform_3, window_bounds = array<i64: 1, 128>}, {transform_indices = @transform_4, window_bounds = array<i64: 1, 128>}, {transform_indices = @transform_5, window_bounds = array<i64: 16, 128>}]} {
    %c0_i32 = arith.constant 0 : i32
    %0 = arith.cmpi eq, %arg2, %c0_i32 : i32
    %1 = arith.extui %0 : i1 to i32
    %c0_i32_0 = arith.constant 0 : i32
    %2 = arith.cmpi ne, %1, %c0_i32_0 : i32
    scf.if %2 {
      %cst_17 = arith.constant 0.000000e+00 : f32
      %17 = vector.broadcast %cst_17 : f32 to vector<16x128xf32>
      %c0_18 = arith.constant 0 : index
      %c0_19 = arith.constant 0 : index
      %18 = vector.load %arg9[%c0_18, %c0_19] : memref<16x128xf32, #tpu.memory_space<vmem>>, vector<16x128xf32>
      tpu.vector_store %arg9[%c0_18, %c0_19], %17 {strides = array<i32>} : memref<16x128xf32, #tpu.memory_space<vmem>>, vector<16x128xf32>,
      %cst_20 = arith.constant 0.000000e+00 : f32
      %19 = vector.broadcast %cst_20 : f32 to vector<16x128xf32>
      %c0_21 = arith.constant 0 : index
      %c0_22 = arith.constant 0 : index
      %20 = vector.load %arg10[%c0_21, %c0_22] : memref<16x128xf32, #tpu.memory_space<vmem>>, vector<16x128xf32>
      tpu.vector_store %arg10[%c0_21, %c0_22], %19 {strides = array<i32>} : memref<16x128xf32, #tpu.memory_space<vmem>>, vector<16x128xf32>,
    } else {
    }
    %c0 = arith.constant 0 : index
    %c0_1 = arith.constant 0 : index
    %3 = vector.load %arg3[%c0, %c0_1] : memref<16x128xf32, #tpu.memory_space<vmem>>, vector<16x128xf32>
    %c0_2 = arith.constant 0 : index
    %c0_3 = arith.constant 0 : index
    %4 = vector.load %arg9[%c0_2, %c0_3] : memref<16x128xf32, #tpu.memory_space<vmem>>, vector<16x128xf32>
    %c0_4 = arith.constant 0 : index
    %c0_5 = arith.constant 0 : index
    %5 = vector.load %arg4[%c0_4, %c0_5] : memref<128x128xf32, #tpu.memory_space<vmem>>, vector<128x128xf32>
    %cst = arith.constant dense<0.000000e+00> : vector<16x128xf32>
    %6 = tpu.matmul %3, %5, %cst {dimension_numbers = #tpu.dot_dimension_numbers<[1], [0], [0], [1], [0, 0, 1, 1], [], []>} : vector<16x128xf32>, vector<128x128xf32>, vector<16x128xf32> -> vector<16x128xf32>
    %7 = arith.addf %4, %6 : vector<16x128xf32>
    %c0_6 = arith.constant 0 : index
    %c0_7 = arith.constant 0 : index
    %8 = vector.load %arg9[%c0_6, %c0_7] : memref<16x128xf32, #tpu.memory_space<vmem>>, vector<16x128xf32>
    tpu.vector_store %arg9[%c0_6, %c0_7], %7 {strides = array<i32>} : memref<16x128xf32, #tpu.memory_space<vmem>>, vector<16x128xf32>,
    %c0_8 = arith.constant 0 : index
    %c0_9 = arith.constant 0 : index
    %9 = vector.load %arg10[%c0_8, %c0_9] : memref<16x128xf32, #tpu.memory_space<vmem>>, vector<16x128xf32>
    %c0_10 = arith.constant 0 : index
    %c0_11 = arith.constant 0 : index
    %10 = vector.load %arg5[%c0_10, %c0_11] : memref<128x128xf32, #tpu.memory_space<vmem>>, vector<128x128xf32>
    %cst_12 = arith.constant dense<0.000000e+00> : vector<16x128xf32>
    %11 = tpu.matmul %3, %10, %cst_12 {dimension_numbers = #tpu.dot_dimension_numbers<[1], [0], [0], [1], [0, 0, 1, 1], [], []>} : vector<16x128xf32>, vector<128x128xf32>, vector<16x128xf32> -> vector<16x128xf32>
    %12 = arith.addf %9, %11 : vector<16x128xf32>
    %c0_13 = arith.constant 0 : index
    %c0_14 = arith.constant 0 : index
    %13 = vector.load %arg10[%c0_13, %c0_14] : memref<16x128xf32, #tpu.memory_space<vmem>>, vector<16x128xf32>
    tpu.vector_store %arg10[%c0_13, %c0_14], %12 {strides = array<i32>} : memref<16x128xf32, #tpu.memory_space<vmem>>, vector<16x128xf32>,
    %c0_i32_15 = arith.constant 0 : i32
    %14 = arith.cmpi eq, %arg2, %c0_i32_15 : i32
    %15 = arith.extui %14 : i1 to i32
    %c0_i32_16 = arith.constant 0 : i32
    %16 = arith.cmpi ne, %15, %c0_i32_16 : i32
    scf.if %16 {
      %c0_17 = arith.constant 0 : index
      %c0_18 = arith.constant 0 : index
      %17 = vector.load %arg9[%c0_17, %c0_18] : memref<16x128xf32, #tpu.memory_space<vmem>>, vector<16x128xf32>
      %c0_19 = arith.constant 0 : index
      %c0_20 = arith.constant 0 : index
      %18 = vector.load %arg6[%c0_19, %c0_20] : memref<1x128xf32, #tpu.memory_space<vmem>>, vector<1x128xf32>
      %19 = vector.broadcast %18 : vector<1x128xf32> to vector<16x128xf32>
      %20 = arith.addf %17, %19 : vector<16x128xf32>
      %c0_21 = arith.constant 0 : index
      %c0_22 = arith.constant 0 : index
      %21 = vector.load %arg10[%c0_21, %c0_22] : memref<16x128xf32, #tpu.memory_space<vmem>>, vector<16x128xf32>
      %c0_23 = arith.constant 0 : index
      %c0_24 = arith.constant 0 : index
      %22 = vector.load %arg7[%c0_23, %c0_24] : memref<1x128xf32, #tpu.memory_space<vmem>>, vector<1x128xf32>
      %23 = vector.broadcast %22 : vector<1x128xf32> to vector<16x128xf32>
      %24 = arith.addf %21, %23 : vector<16x128xf32>
      %25 = arith.negf %24 : vector<16x128xf32>
      %26 = math.exp %25 : vector<16x128xf32>
      %cst_25 = arith.constant 1.000000e+00 : f32
      %27 = vector.broadcast %cst_25 : f32 to vector<16x128xf32>
      %28 = arith.addf %27, %26 : vector<16x128xf32>
      %29 = arith.divf %27, %28 : vector<16x128xf32>
      %30 = arith.mulf %24, %29 : vector<16x128xf32>
      %31 = arith.mulf %20, %30 : vector<16x128xf32>
      %c0_26 = arith.constant 0 : index
      %c0_27 = arith.constant 0 : index
      %32 = vector.load %arg8[%c0_26, %c0_27] : memref<16x128xf32, #tpu.memory_space<vmem>>, vector<16x128xf32>
      tpu.vector_store %arg8[%c0_26, %c0_27], %31 {strides = array<i32>} : memref<16x128xf32, #tpu.memory_space<vmem>>, vector<16x128xf32>,
    } else {
    }
    return
  }
  func.func @transform_0(%arg0: i32, %arg1: i32, %arg2: i32) -> (i32, i32) {
    %c0_i32 = arith.constant 0 : i32
    return %arg0, %arg2 : i32, i32
  }
  func.func @transform_1(%arg0: i32, %arg1: i32, %arg2: i32) -> (i32, i32) {
    %c0_i32 = arith.constant 0 : i32
    return %arg2, %arg1 : i32, i32
  }
  func.func @transform_2(%arg0: i32, %arg1: i32, %arg2: i32) -> (i32, i32) {
    %c0_i32 = arith.constant 0 : i32
    return %arg2, %arg1 : i32, i32
  }
  func.func @transform_3(%arg0: i32, %arg1: i32, %arg2: i32) -> (i32, i32) {
    %c0_i32 = arith.constant 0 : i32
    %c0_i32_0 = arith.constant 0 : i32
    return %c0_i32, %arg1 : i32, i32
  }
  func.func @transform_4(%arg0: i32, %arg1: i32, %arg2: i32) -> (i32, i32) {
    %c0_i32 = arith.constant 0 : i32
    %c0_i32_0 = arith.constant 0 : i32
    return %c0_i32, %arg1 : i32, i32
  }
  func.func @transform_5(%arg0: i32, %arg1: i32, %arg2: i32) -> (i32, i32) {
    %c0_i32 = arith.constant 0 : i32
    return %arg0, %arg1 : i32, i32
  }
}

</mosaic_0001>

<bundles_post_ra>
// kernel: tpu_custom_call.1
= control target key start
LH: loop header
LB: loop body
LE: loop exit
PB: predicated region body
PF: predicated region fallthrough
CT: control target
= control target key end

     0   :  { %10 = vsyncpa [#allocation5], 0  ;;  %s718_s0 = inlined_call_operand.hbm [shape: f32[16,128], index: 0, kind: input, shape index: {}]   ;;  %s719_s1 = inlined_call_operand.hbm [shape: f32[128,128], index: 1, kind: input, shape index: {}]   ;;  %s720_s2 = inlined_call_operand.hbm [shape: f32[128,128], index: 2, kind: input, shape index: {}]   ;;  %s721_s3 = inlined_call_operand.vmem [shape: f32[1,128], index: 3, kind: input, shape index: {}]   ;;  %s722_s4 = inlined_call_operand.vmem [shape: f32[1,128], index: 4, kind: input, shape index: {}]   ;;  %s723_s5 = inlined_call_operand.hbm [shape: f32[16,128], index: 5, kind: output, shape index: {}]  }
   0x1   :  { %11 = vsyncpa [#allocation8], 0 }
   0x2   :  { %12 = vsyncpa [#allocation6], 0  ;;  %s609_s18 = smov [#allocation7]   ;;  %s610_s20 = smov [#allocation4]  }
   0x3   :  { %s30_s19 = sshll.u32 %s609_s18, 4  ;;  %s18_s21 = sshll.u32 %s610_s20, 4  ;;  %s31_s19 = int_to_ptr.vmem [resolvable:$true] %s30_s19  ;;  %s645_s21 = int_to_ptr.vmem [resolvable:$true] %s18_s21 }
   0x4   :  { %s515_s24 = scalar_lea.hbm %s719_s1, 2048 }
   0x5   :  { %p516_p0 = scmp.ne.s32.totalorder %s719_s1, %s515_s24  ;;  %p519_p1 = scmp.lt.u32.totalorder %s515_s24, %s719_s1 }
   0x7   :  { %p521_p2 = pnand %p519_p1, %p516_p0 }
   0x9   :  { %524 = shalt.err (!%p521_p2)
}
   0xa   :  { %s525_s29 = scalar_lea.vmem %s31_s19, 2048  ;;  %p530_p4 = scmp.lt.s32.totalorder %s31_s19, %s31_s19 }
   0xb   :  { %p526_p3 = scmp.ne.s32.totalorder %s31_s19, %s525_s29  ;;  %p531_p5 = scmp.lt.s32.totalorder %s525_s29, %s525_s29 }
   0xd   :  { %p532_p6 = por %p531_p5, %p530_p4 }
   0xf   :  { %p533_p7 = pnand %p532_p6, %p526_p3 }
  0x11   :  { %536 = shalt.err (!%p533_p7)
}
  0x12   :  { %s611_s30 = smov 128   ;;  %s612_s6 = smov 8  }
  0x13   :  { %36 = dma.hbm_to_vmem [thread:$0]  %s719_s1, 2048, %s31_s19, [#allocation8], %s611_s30, %s611_s30, %s612_s6  }
  0x14   :  { %s537_s11 = scalar_lea.hbm %s718_s0, 256 }
  0x15   :  { %p538_p8 = scmp.ne.s32.totalorder %s718_s0, %s537_s11  ;;  %p541_p9 = scmp.lt.u32.totalorder %s537_s11, %s718_s0 }
  0x17   :  { %p543_p10 = pnand %p541_p9, %p538_p8 }
  0x19   :  { %546 = shalt.err (!%p543_p10)
}
  0x1a   :  { %s547_s16 = scalar_lea.vmem %s645_s21, 256  ;;  %p552_p12 = scmp.lt.s32.totalorder %s645_s21, %s645_s21 }
  0x1b   :  { %p548_p11 = scmp.ne.s32.totalorder %s645_s21, %s547_s16  ;;  %p553_p13 = scmp.lt.s32.totalorder %s547_s16, %s547_s16 }
  0x1d   :  { %p554_p0 = por %p553_p13, %p552_p12 }
  0x1f   :  { %p555_p1 = pnand %p554_p0, %p548_p11 }
  0x21   :  { %558 = shalt.err (!%p555_p1)
}
  0x22   :  { %24 = dma.hbm_to_vmem [thread:$0]  %s718_s0, 256, %s645_s21, [#allocation5], %s611_s30, %s611_s30, %s612_s6  }
  0x23   :  { %s613_s18 = smov [#allocation9]   ;;  %s559_s23 = scalar_lea.hbm %s720_s2, 2048 }
  0x24   :  { %s42_s19 = sshll.u32 %s613_s18, 4  ;;  %p560_p2 = scmp.ne.s32.totalorder %s720_s2, %s559_s23  ;;  %s43_s19 = int_to_ptr.vmem [resolvable:$true] %s42_s19 }
  0x25   :  { %p563_p3 = scmp.lt.u32.totalorder %s559_s23, %s720_s2 }
  0x27   :  { %p565_p4 = pnand %p563_p3, %p560_p2 }
  0x29   :  { %568 = shalt.err (!%p565_p4)
}
  0x2a   :  { %s569_s28 = scalar_lea.vmem %s43_s19, 2048  ;;  %p574_p6 = scmp.lt.s32.totalorder %s43_s19, %s43_s19 }
  0x2b   :  { %p570_p5 = scmp.ne.s32.totalorder %s43_s19, %s569_s28  ;;  %p575_p7 = scmp.lt.s32.totalorder %s569_s28, %s569_s28 }
  0x2d   :  { %p576_p8 = por %p575_p7, %p574_p6 }
  0x2f   :  { %p577_p9 = pnand %p576_p8, %p570_p5 }
  0x31   :  { %580 = shalt.err (!%p577_p9)
}
  0x32   :  { %48 = dma.hbm_to_vmem [thread:$0]  %s720_s2, 2048, %s43_s19, [#allocation8], %s611_s30, %s611_s30, %s612_s6  }
  0x33   :  { %603 = dma.done.wait [#allocation5], 256  }
  0x34   :  { %604 = vsyncadd [#allocation5], 4294967040 }
  0x35   :  { %605 = dma.done.wait [#allocation8], 4096  }
  0x36   :  { %606 = vsyncadd [#allocation8], 4294963200  ;;  %v171_v0 = vld [vmem:[#allocation9] sm:$0xff]  ;;  %v172_v1 = vld [vmem:[#allocation9 + $0x8] sm:$0xff] }
  0x37   :  { %v173_v2 = vld [vmem:[#allocation9 + $0x10] sm:$0xff]  ;;  %v469_v3 = vpack.c.bf16 %v172_v1, %v171_v0  ;;  %v174_v4 = vld [vmem:[#allocation9 + $0x18] sm:$0xff]  ;;  %v175_v6 = vld [vmem:[#allocation9 + $0x20] sm:$0xff] }
  0x38   :  { %v473_v5 = vpack.c.bf16 %v174_v4, %v173_v2  ;;  %v176_v7 = vld [vmem:[#allocation9 + $0x28] sm:$0xff]  ;;  %v74_v8 = vld [vmem:[#allocation7] sm:$0xff]  ;;  %v177_v10 = vld [vmem:[#allocation9 + $0x30] sm:$0xff] }
  0x39   :  { %470 = vmatprep.subr.bf16.mxu1 %v469_v3  ;;  %v477_v9 = vpack.c.bf16 %v176_v7, %v175_v6  ;;  %v178_v11 = vld [vmem:[#allocation9 + $0x38] sm:$0xff]  ;;  %v75_v12 = vld [vmem:[#allocation7 + $0x8] sm:$0xff]  ;;  %v76_v14 = vld [vmem:[#allocation7 + $0x10] sm:$0xff] }
  0x3a   :  { %472 = vmatpush3.bf16.msra.mxu1 %v469_v3  ;;  %v437_v13 = vpack.c.bf16 %v75_v12, %v74_v8  ;;  %v77_v15 = vld [vmem:[#allocation7 + $0x18] sm:$0xff]  ;;  %v70_v16 = vld [vmem:[#allocation4] sm:$0xff]  ;;  %v78_v18 = vld [vmem:[#allocation7 + $0x20] sm:$0xff]  ;;  %v481_v20 = vpack.c.bf16 %v178_v11, %v177_v10 }
  0x3b   :  { %474 = vmatprep.subr.bf16.mxu1 %v473_v5  ;;  %v441_v17 = vpack.c.bf16 %v77_v15, %v76_v14  ;;  %434 = vmatprep.mubr.f32.mxu1 %v70_v16  ;;  %v79_v19 = vld [vmem:[#allocation7 + $0x28] sm:$0xff]  ;;  %v179_v21 = vld [vmem:[#allocation9 + $0x40] sm:$0xff]  ;;  %v80_v24 = vld [vmem:[#allocation7 + $0x30] sm:$0xff] }
  0x3c   :  { %399 = vmatprep.mubr.f32.mxu0 %v70_v16  ;;  %438 = vmatprep.subr.bf16.mxu0 %v437_v13  ;;  %v180_v22 = vld [vmem:[#allocation9 + $0x48] sm:$0xff]  ;;  %v445_v23 = vpack.c.bf16 %v79_v19, %v78_v18  ;;  %v81_v25 = vld [vmem:[#allocation7 + $0x38] sm:$0xff]  ;;  %v181_v27 = vld [vmem:[#allocation9 + $0x50] sm:$0xff] }
  0x3d   :  { %440 = vmatpush3.bf16.msra.mxu0 %v437_v13  ;;  %v485_v26 = vpack.c.bf16 %v180_v22, %v179_v21  ;;  %v182_v28 = vld [vmem:[#allocation9 + $0x58] sm:$0xff]  ;;  %v449_v29 = vpack.c.bf16 %v81_v25, %v80_v24  ;;  %v82_v30 = vld [vmem:[#allocation7 + $0x40] sm:$0xff]  ;;  %v83_v31 = vld [vmem:[#allocation7 + $0x48] sm:$0xff] }
  0x3e   :  { %476 = vmatpush3.bf16.msra.mxu1 %v473_v5  ;;  %442 = vmatprep.subr.bf16.mxu0 %v441_v17  ;;  %v489_v32 = vpack.c.bf16 %v182_v28, %v181_v27  ;;  %v183_v33 = vld [vmem:[#allocation9 + $0x60] sm:$0xff]  ;;  %v184_v34 = vld [vmem:[#allocation9 + $0x68] sm:$0xff]  ;;  %v453_v35 = vpack.c.bf16 %v83_v31, %v82_v30  ;;  %v84_v36 = vld [vmem:[#allocation7 + $0x50] sm:$0xff] }
  0x3f   :  { %478 = vmatprep.subr.bf16.mxu1 %v477_v9  ;;  %v85_v37 = vld [vmem:[#allocation7 + $0x58] sm:$0xff]  ;;  %v493_v38 = vpack.c.bf16 %v184_v34, %v183_v33  ;;  %v185_v39 = vld [vmem:[#allocation9 + $0x70] sm:$0xff]  ;;  %v86_v42 = vld [vmem:[#allocation7 + $0x60] sm:$0xff] }
  0x40   :  { %v186_v40 = vld [vmem:[#allocation9 + $0x78] sm:$0xff]  ;;  %v457_v41 = vpack.c.bf16 %v85_v37, %v84_v36  ;;  %v87_v43 = vld [vmem:[#allocation7 + $0x68] sm:$0xff]  ;;  %v88_v46 = vld [vmem:[#allocation7 + $0x70] sm:$0xff] }
  0x41   :  { %444 = vmatpush3.bf16.msra.mxu0 %v441_v17  ;;  %v497_v44 = vpack.c.bf16 %v186_v40, %v185_v39  ;;  %v461_v45 = vpack.c.bf16 %v87_v43, %v86_v42  ;;  %v89_v47 = vld [vmem:[#allocation7 + $0x78] sm:$0xff]  ;;  %v328_v50 = vld [vmem:[%s722_s4] ss:$0 sm:$0xff]  ;;  %s614_s4 = smov [#allocation10]  }
  0x42   :  { %480 = vmatpush3.bf16.msra.mxu1 %v477_v9  ;;  %446 = vmatprep.subr.bf16.mxu0 %v445_v23  ;;  %v465_v48 = vpack.c.bf16 %v89_v47, %v88_v46  ;;  %v71_v49 = vld [vmem:[#allocation4 + $0x8] sm:$0xff]  ;;  %v327_v63 = vld [vmem:[%s721_s3] ss:$0 sm:$0xff]  ;;  %s314_s9 = sshll.u32 %s614_s4, 4  ;;  %s315_s9 = int_to_ptr.vmem [resolvable:$true] %s314_s9 }
  0x43   :  { %482 = vmatprep.subr.bf16.mxu1 %v481_v20  ;;  %s581_s10 = scalar_lea.vmem %s315_s9, 256  ;;  %p586_p11 = scmp.lt.s32.totalorder %s315_s9, %s315_s9 }
  0x44   :  { %p582_p10 = scmp.ne.s32.totalorder %s315_s9, %s581_s10  ;;  %p587_p12 = scmp.lt.s32.totalorder %s581_s10, %s581_s10 }
  0x45   :  { %448 = vmatpush3.bf16.msra.mxu0 %v445_v23 }
  0x46   :  { %484 = vmatpush3.bf16.msra.mxu1 %v481_v20  ;;  %450 = vmatprep.subr.bf16.mxu0 %v449_v29  ;;  %p588_p13 = por %p587_p12, %p586_p11 }
  0x47   :  { %486 = vmatprep.subr.bf16.mxu1 %v485_v26 }
  0x48   :  { %p589_p0 = pnand %p588_p13, %p582_p10 }
  0x49   :  { %452 = vmatpush3.bf16.msra.mxu0 %v449_v29 }
  0x4a   :  { %488 = vmatpush3.bf16.msra.mxu1 %v485_v26  ;;  %454 = vmatprep.subr.bf16.mxu0 %v453_v35 }
  0x4b   :  { %490 = vmatprep.subr.bf16.mxu1 %v489_v32 }
  0x4d   :  { %456 = vmatpush3.bf16.msra.mxu0 %v453_v35 }
  0x4e   :  { %492 = vmatpush3.bf16.msra.mxu1 %v489_v32  ;;  %458 = vmatprep.subr.bf16.mxu0 %v457_v41 }
  0x4f   :  { %494 = vmatprep.subr.bf16.mxu1 %v493_v38 }
  0x51   :  { %460 = vmatpush3.bf16.msra.mxu0 %v457_v41 }
  0x52   :  { %496 = vmatpush3.bf16.msra.mxu1 %v493_v38  ;;  %462 = vmatprep.subr.bf16.mxu0 %v461_v45 }
  0x53   :  { %498 = vmatprep.subr.bf16.mxu1 %v497_v44 }
  0x55   :  { %464 = vmatpush3.bf16.msra.mxu0 %v461_v45 }
  0x56   :  { %500 = vmatpush3.bf16.msra.mxu1 %v497_v44  ;;  %466 = vmatprep.subr.bf16.mxu0 %v465_v48 }
  0x59   :  { %435 = vmatmul.mubr.f32.vlgmr.msra.gmra.mrb[0].mxu1 %v71_v49  ;;  %468 = vmatpush3.bf16.msra.mxu0 %v465_v48 }
  0x5c   :  { %400 = vmatmul.mubr.f32.vlgmr.msra.gmra.mrb[0].mxu0 %v71_v49 }
 0x12c   :  { %v436_v51 = vpop.f32.mrb[0].mxu1 }
 0x12d   :  { %v290_v52 = vadd.f32 %v436_v51, %v328_v50  ;;  %v253_v53 = vpop.f32.mrb[1].mxu1 }
 0x12e   :  { %v289_v54 = vadd.f32 %v328_v50, %v253_v53 }
 0x12f   :  { %v330_v55 = vmul.f32 -1.442695, %v290_v52  ;;  %v401_v57 = vpop.f32.mrb[0].mxu0 }
 0x130   :  { %v329_v56 = vmul.f32 -1.442695, %v289_v54  ;;  %v156_v58 = vpop.f32.mrb[1].mxu0  ;;  %v279_v0 = vadd.f32 %v401_v57, %v327_v63 }
 0x131   :  { %507 = vpow2.f32 %v330_v55  ;;  %v278_v2 = vadd.f32 %v327_v63, %v156_v58 }
 0x132   :  { %509 = vpow2.f32 %v329_v56 }
 0x13b   :  { %v508_v59 = vpop.eup %507 }
 0x13c   :  { %v510_v60 = vpop.eup %509  ;;  %v298_v61 = vadd.f32 1.0, %v508_v59 }
 0x13d   :  { %v297_v62 = vadd.f32 1.0, %v510_v60 }
 0x13e   :  { %511 = vrcp.f32 %v298_v61 }
 0x13f   :  { %513 = vrcp.f32 %v297_v62 }
 0x148   :  { %v512_v1 = vpop.eup %511 }
 0x149   :  { %v514_v3 = vpop.eup %513  ;;  %v304_v4 = vmul.f32 %v512_v1, %v290_v52 }
 0x14a   :  { %v303_v5 = vmul.f32 %v514_v3, %v289_v54 }
 0x14b   :  { %v306_v6 = vmul.f32 %v304_v4, %v279_v0 }
 0x14c   :  { %v305_v7 = vmul.f32 %v303_v5, %v278_v2 }
 0x14d   :  { %308 = vst [vmem:[#allocation10 + $0x8] sm:$0xff] %v306_v6 }
 0x14e   :  { %307 = vst [vmem:[#allocation10] sm:$0xff] %v305_v7 }
 0x14f   :  { %592 = shalt.err (!%p589_p0)
}
 0x150   :  { %s593_s12 = scalar_lea.hbm %s723_s5, 256 }
 0x151   :  { %p594_p1 = scmp.ne.s32.totalorder %s723_s5, %s593_s12  ;;  %p597_p2 = scmp.lt.u32.totalorder %s593_s12, %s723_s5 }
 0x153   :  { %p599_p3 = pnand %p597_p2, %p594_p1 }
 0x155   :  { %602 = shalt.err (!%p599_p3)
}
 0x156   :  { %320 = dma.vmem_to_hbm [thread:$0]  %s315_s9, 256, %s723_s5, [#allocation6], %s611_s30, %s611_s30, %s612_s6  }
 0x157   :  { %607 = dma.done.wait [#allocation6], 256  }
 0x158   :  { %608 = vsyncadd [#allocation6], 4294967040 }
 0x159   :  { %324 = vsyncpa [#allocation5], 1 }
 0x15a   :  { %325 = vsyncpa [#allocation8], 1 }
 0x15b   :  { %326 = vsyncpa [#allocation6], 1 }

</bundles_post_ra>
